<compile_context>
chip_gen: v5e
topology: v5e:2x2
jax: 0.10.0
libtpu: 0.0.40
codegen_flags: <defaults>
</compile_context>

<pallas_src>
import functools

import jax
import jax.numpy as jnp
from jax import lax
from jax.experimental import pallas as pl
from jax.experimental.pallas import tpu as pltpu

DS = 8  # BAM pooling / upsampling factor (default ds=8)


# ---------------------------------------------------------------------------
# BAM (positional / basic self-attention) kernel: runs on pooled features,
# channels-last. Per batch b:
#   qkv    = x @ [scale*Wq | Wk | Wv] + [scale*bq | bk | bv]      (N, 2Ck+C)
#   energy = q @ k^T   (contract last dims; scale already folded into q)
#   attn   = softmax(energy, -1)
#   out    = attn @ v                                             (N, C)
# which equals bmm(value, attention^T) of the NCHW reference.
# ---------------------------------------------------------------------------
def _bam_attn_kernel(x_ref, w_ref, b_ref, o_ref, *, ck):
    x = x_ref[0]                                                   # (N, C)
    qkv = jnp.dot(x, w_ref[...], preferred_element_type=jnp.float32) + b_ref[...]
    q = qkv[:, :ck]                                                # (N, Ck) pre-scaled
    k = qkv[:, ck:2 * ck]                                          # (N, Ck)
    v = qkv[:, 2 * ck:]                                            # (N, C)
    # energy[i, j] = sum_c q[i, c] * k[j, c]  -- no explicit transpose
    energy = lax.dot_general(q, k, (((1,), (1,)), ((), ())),
                             preferred_element_type=jnp.float32)   # (N, N)
    e = energy - jnp.max(energy, axis=-1, keepdims=True)
    p = jnp.exp(e)
    attn = p * pl.reciprocal(jnp.sum(p, axis=-1, keepdims=True), approx=False)
    o_ref[0] = jnp.dot(attn, v, preferred_element_type=jnp.float32)


def bam_attention(x_nc, w_qkv, b_qkv):
    """x_nc: (B, N, C) pooled, channels-last. w_qkv: (C, 2Ck+C). Returns (B, N, C)."""
    B, N, C = x_nc.shape
    F = w_qkv.shape[1]
    Ck = (F - C) // 2
    kernel = functools.partial(_bam_attn_kernel, ck=Ck)
    return pl.pallas_call(
        kernel,
        out_shape=jax.ShapeDtypeStruct((B, N, C), jnp.float32),
        grid=(B,),
        in_specs=[
            pl.BlockSpec((1, N, C), lambda b: (b, 0, 0)),
            pl.BlockSpec((C, F), lambda b: (0, 0)),
            pl.BlockSpec((1, F), lambda b: (0, 0)),
        ],
        out_specs=pl.BlockSpec((1, N, C), lambda b: (b, 0, 0)),
        compiler_params=pltpu.CompilerParams(dimension_semantics=("parallel",)),
    )(x_nc, w_qkv, b_qkv)


# ---------------------------------------------------------------------------
# CAM (channel attention) kernel. Per batch b, xf = (C, HW):
#   energy = xf @ xf^T                        (C, C)
#   attn   = softmax(rowmax(E) - E)  ==  softmax-stable(rowmin(E) - E)
#   out    = gamma * (attn @ xf) + xf
# ---------------------------------------------------------------------------
def _cam_kernel(x_ref, gamma_ref, o_ref):
    x = x_ref[0]                                                   # (C, HW)
    # energy[i, j] = sum_hw x[i, hw] * x[j, hw] -- no explicit transpose
    energy = lax.dot_general(x, x, (((1,), (1,)), ((), ())),
                             preferred_element_type=jnp.float32)   # (C, C)
    # (rowmax(E) - E) stabilized for softmax  ==  rowmin(E) - E  (bit-identical)
    e = jnp.min(energy, axis=-1, keepdims=True) - energy
    p = jnp.exp(e)
    attn = p * pl.reciprocal(jnp.sum(p, axis=-1, keepdims=True), approx=False)
    out = jnp.dot(attn, x, preferred_element_type=jnp.float32)     # (C, HW)
    o_ref[0] = gamma_ref[0] * out + x


def cam_attention(x_flat, gamma):
    """x_flat: (B, C, HW). gamma: (1,) scalar param. Returns (B, C, HW)."""
    B, C, HW = x_flat.shape
    # Raise the scoped VMEM limit when the whole-image block is large
    # (double-buffered in/out blocks + energy/attn intermediates).
    # TODO(synk): on v7x (64 MiB VMEM) tile the HW axis with an f32 (C, C)
    #             energy accumulator instead of holding the full image resident.
    need_bytes = 4 * (4 * C * HW + 2 * C * C)
    vmem_limit = None if need_bytes < (24 << 20) else int(min(need_bytes + (8 << 20), 112 << 20))
    return pl.pallas_call(
        _cam_kernel,
        out_shape=jax.ShapeDtypeStruct((B, C, HW), jnp.float32),
        grid=(B,),
        in_specs=[
            pl.BlockSpec((1, C, HW), lambda b: (b, 0, 0)),
            pl.BlockSpec(memory_space=pltpu.MemorySpace.SMEM),     # scalar gamma
        ],
        out_specs=pl.BlockSpec((1, C, HW), lambda b: (b, 0, 0)),
        compiler_params=pltpu.CompilerParams(
            dimension_semantics=("parallel",),
            vmem_limit_bytes=vmem_limit,
        ),
    )(x_flat, gamma)


# ---------------------------------------------------------------------------
# PCAM forward (glue: pooling / reshapes / nearest upsample / concat in JAX;
# XLA fuses the broadcast-upsample with the residual add into one HBM pass).
# ---------------------------------------------------------------------------
def pcam_forward(x, params, ds=DS):
    """x: (B, C, H, W) NCHW float32. Returns (B, 2*C, H, W)."""
    B, C, H, W = x.shape
    if H % ds or W % ds:
        # TODO(synk): PyTorch AvgPool2d/interpolate tolerate non-divisible sizes;
        # this port requires H, W to be multiples of ds.
        raise ValueError(f"H={H}, W={W} must be divisible by ds={ds}")
    Hs, Ws = H // ds, W // ds
    N = Hs * Ws
    key_channel = C // 8
    scale = float(key_channel) ** (-0.5)

    # Fused QKV weight / bias, with the energy scale folded into the Q columns.
    w_qkv = jnp.concatenate([params["wq"] * scale, params["wk"], params["wv"]], axis=1)
    b_qkv = jnp.concatenate([params["bq"] * scale, params["bk"], params["bv"]], axis=1)

    # ---- BAM branch ----
    xp = x.reshape(B, C, Hs, ds, Ws, ds).mean(axis=(3, 5))          # AvgPool2d(ds)
    xp_nc = xp.reshape(B, C, N).transpose(0, 2, 1)                  # (B, N, C)
    out_nc = bam_attention(xp_nc, w_qkv, b_qkv)                     # (B, N, C)
    out_bchw = out_nc.transpose(0, 2, 1).reshape(B, C, Hs, Ws)
    # nearest upsample = single broadcast + reshape, fused with residual add
    out1 = jnp.broadcast_to(
        out_bchw[:, :, :, None, :, None], (B, C, Hs, ds, Ws, ds)
    ).reshape(B, C, H, W) + x

    # ---- CAM branch ----
    out2 = cam_attention(x.reshape(B, C, H * W), params["gamma_cam"]).reshape(B, C, H, W)

    return jnp.concatenate([out1, out2], axis=1)


# ---------------------------------------------------------------------------
# Pure-JAX reference (mirrors the PyTorch forward) for a correctness check.
# ---------------------------------------------------------------------------
def pcam_reference(x, params, ds=DS):
    B, C, H, W = x.shape
    Hs, Ws = H // ds, W // ds
    N = Hs * Ws
    scale = float(C // 8) ** (-0.5)
    xp = x.reshape(B, C, Hs, ds, Ws, ds).mean(axis=(3, 5)).reshape(B, C, N)
    xn = xp.transpose(0, 2, 1)                                      # (B, N, C)
    q = xn @ params["wq"] + params["bq"]
    k = xn @ params["wk"] + params["bk"]
    v = xn @ params["wv"] + params["bv"]
    energy = scale * jnp.einsum("bic,bjc->bij", q, k)
    attn = jax.nn.softmax(energy, axis=-1)
    outp = jnp.einsum("bij,bjc->bic", attn, v).transpose(0, 2, 1).reshape(B, C, Hs, Ws)
    out1 = jnp.repeat(jnp.repeat(outp, ds, axis=2), ds, axis=3) + x
    xf = x.reshape(B, C, H * W)
    eng = jnp.einsum("bci,bdi->bcd", xf, xf)
    eng_new = jnp.max(eng, axis=-1, keepdims=True) - eng
    catt = jax.nn.softmax(eng_new, axis=-1)
    out2 = (params["gamma_cam"][0] * jnp.einsum("bcd,bdi->bci", catt, xf) + xf).reshape(B, C, H, W)
    return jnp.concatenate([out1, out2], axis=1)


# ---------------------------------------------------------------------------
if __name__ == "__main__":
    key = jax.random.PRNGKey(0)
    B, C, H, W = 2, 16, 16, 16          # in_dim=16 -> key_channel=2; pooled 2x2
    Ck = C // 8

    ks = jax.random.split(key, 8)
    x = jax.random.normal(ks[0], (B, C, H, W), dtype=jnp.float32)

    # 1x1 conv weights expressed as (C_in, C_out) matrices; deterministic init.
    params = {
        "wq": 0.1 * jax.random.normal(ks[1], (C, Ck), dtype=jnp.float32),
        "bq": 0.01 * jax.random.normal(ks[2], (1, Ck), dtype=jnp.float32),
        "wk": 0.1 * jax.random.normal(ks[3], (C, Ck), dtype=jnp.float32),
        "bk": 0.01 * jax.random.normal(ks[4], (1, Ck), dtype=jnp.float32),
        "wv": 0.1 * jax.random.normal(ks[5], (C, C), dtype=jnp.float32),
        "bv": 0.01 * jax.random.normal(ks[6], (1, C), dtype=jnp.float32),
        # nn.Parameter(torch.zeros(1)) in CAM_Module; nonzero here to exercise path
        "gamma_cam": jnp.full((1,), 0.5, dtype=jnp.float32),
    }

    out = jax.jit(pcam_forward)(x, params)
    jax.block_until_ready(out)
    assert out.shape == (B, 2 * C, H, W), out.shape

    ref = pcam_reference(x, params)
    assert jnp.allclose(out, ref, rtol=2e-3, atol=2e-3), float(jnp.max(jnp.abs(out - ref)))

    print("KERNEL_OK")
</pallas_src>

<mosaic_0001>
module attributes {stable_mosaic.version = 11 : i64} {
  func.func @_bam_attn_kernel(%arg0: i32, %arg1: memref<1x4x16xf32, #tpu.memory_space<vmem>>, %arg2: memref<16x20xf32, #tpu.memory_space<vmem>>, %arg3: memref<1x20xf32, #tpu.memory_space<vmem>>, %arg4: memref<1x4x16xf32, #tpu.memory_space<vmem>>) attributes {dimension_semantics = [#tpu.dimension_semantics<parallel>], iteration_bounds = array<i64: 2>, scalar_prefetch = 0 : i64, scratch_operands = 0 : i64, tpu.core_type = #tpu.core_type<tc>, window_params = [{transform_indices = @transform_0, window_bounds = array<i64: 1, 4, 16>}, {pipeline_mode = #tpu.pipeline_mode<synchronous>, transform_indices = @transform_1, window_bounds = array<i64: 16, 20>}, {pipeline_mode = #tpu.pipeline_mode<synchronous>, transform_indices = @transform_2, window_bounds = array<i64: 1, 20>}, {transform_indices = @transform_3, window_bounds = array<i64: 1, 4, 16>}]} {
    %c0 = arith.constant 0 : index
    %c0_0 = arith.constant 0 : index
    %c0_1 = arith.constant 0 : index
    %0 = vector.load %arg1[%c0, %c0_0, %c0_1] : memref<1x4x16xf32, #tpu.memory_space<vmem>>, vector<1x4x16xf32>
    %1 = vector.shape_cast %0 : vector<1x4x16xf32> to vector<4x16xf32>
    %c0_2 = arith.constant 0 : index
    %c0_3 = arith.constant 0 : index
    %2 = vector.load %arg2[%c0_2, %c0_3] : memref<16x20xf32, #tpu.memory_space<vmem>>, vector<16x20xf32>
    %cst = arith.constant dense<0.000000e+00> : vector<4x20xf32>
    %3 = tpu.matmul %1, %2, %cst {dimension_numbers = #tpu.dot_dimension_numbers<[1], [0], [0], [1], [0, 0, 1, 1], [], []>} : vector<4x16xf32>, vector<16x20xf32>, vector<4x20xf32> -> vector<4x20xf32>
    %c0_4 = arith.constant 0 : index
    %c0_5 = arith.constant 0 : index
    %4 = vector.load %arg3[%c0_4, %c0_5] : memref<1x20xf32, #tpu.memory_space<vmem>>, vector<1x20xf32>
    %5 = vector.broadcast %4 : vector<1x20xf32> to vector<4x20xf32>
    %6 = arith.addf %3, %5 : vector<4x20xf32>
    %7 = vector.extract_strided_slice %6 {offsets = [0, 0], sizes = [4, 2], strides = [1, 1]} : vector<4x20xf32> to vector<4x2xf32>
    %8 = vector.extract_strided_slice %6 {offsets = [0, 2], sizes = [4, 2], strides = [1, 1]} : vector<4x20xf32> to vector<4x2xf32>
    %9 = vector.extract_strided_slice %6 {offsets = [0, 4], sizes = [4, 16], strides = [1, 1]} : vector<4x20xf32> to vector<4x16xf32>
    %cst_6 = arith.constant dense<0.000000e+00> : vector<4x4xf32>
    %10 = tpu.matmul %7, %8, %cst_6 {dimension_numbers = #tpu.dot_dimension_numbers<[1], [1], [0], [0], [0, 0, 1, 0], [], []>} : vector<4x2xf32>, vector<4x2xf32>, vector<4x4xf32> -> vector<4x4xf32>
    %cst_7 = arith.constant dense<0xFF800000> : vector<4xf32>
    %11 = vector.multi_reduction <maximumf>, %10, %cst_7 [1] : vector<4x4xf32> to vector<4xf32>
    %12 = vector.shape_cast %11 : vector<4xf32> to vector<4x1xf32>
    %13 = vector.broadcast %12 : vector<4x1xf32> to vector<4x4xf32>
    %14 = arith.subf %10, %13 : vector<4x4xf32>
    %15 = math.exp %14 : vector<4x4xf32>
    %cst_8 = arith.constant dense<0.000000e+00> : vector<4xf32>
    %16 = vector.multi_reduction <add>, %15, %cst_8 [1] : vector<4x4xf32> to vector<4xf32>
    %17 = vector.shape_cast %16 : vector<4xf32> to vector<4x1xf32>
    %18 = tpu.reciprocal %17 : vector<4x1xf32> -> vector<4x1xf32>
    %19 = vector.broadcast %18 : vector<4x1xf32> to vector<4x4xf32>
    %20 = arith.mulf %15, %19 : vector<4x4xf32>
    %cst_9 = arith.constant dense<0.000000e+00> : vector<4x16xf32>
    %21 = tpu.matmul %20, %9, %cst_9 {dimension_numbers = #tpu.dot_dimension_numbers<[1], [0], [0], [1], [0, 0, 1, 1], [], []>} : vector<4x4xf32>, vector<4x16xf32>, vector<4x16xf32> -> vector<4x16xf32>
    %c0_10 = arith.constant 0 : index
    %c0_11 = arith.constant 0 : index
    %c0_12 = arith.constant 0 : index
    %22 = vector.load %arg4[%c0_10, %c0_11, %c0_12] : memref<1x4x16xf32, #tpu.memory_space<vmem>>, vector<1x4x16xf32>
    %23 = vector.shape_cast %22 : vector<1x4x16xf32> to vector<4x16xf32>
    %24 = vector.shape_cast %21 : vector<4x16xf32> to vector<1x4x16xf32>
    tpu.vector_store %arg4[%c0_10, %c0_11, %c0_12], %24 {strides = array<i32>} : memref<1x4x16xf32, #tpu.memory_space<vmem>>, vector<1x4x16xf32>,
    return
  }
  func.func @transform_0(%arg0: i32) -> (i32, i32, i32) {
    %c0_i32 = arith.constant 0 : i32
    %c0_i32_0 = arith.constant 0 : i32
    %c0_i32_1 = arith.constant 0 : i32
    return %arg0, %c0_i32, %c0_i32_0 : i32, i32, i32
  }
  func.func @transform_1(%arg0: i32) -> (i32, i32) {
    %c0_i32 = arith.constant 0 : i32
    %c0_i32_0 = arith.constant 0 : i32
    %c0_i32_1 = arith.constant 0 : i32
    return %c0_i32, %c0_i32_0 : i32, i32
  }
  func.func @transform_2(%arg0: i32) -> (i32, i32) {
    %c0_i32 = arith.constant 0 : i32
    %c0_i32_0 = arith.constant 0 : i32
    %c0_i32_1 = arith.constant 0 : i32
    return %c0_i32, %c0_i32_0 : i32, i32
  }
  func.func @transform_3(%arg0: i32) -> (i32, i32, i32) {
    %c0_i32 = arith.constant 0 : i32
    %c0_i32_0 = arith.constant 0 : i32
    %c0_i32_1 = arith.constant 0 : i32
    return %arg0, %c0_i32, %c0_i32_0 : i32, i32, i32
  }
}

module attributes {stable_mosaic.version = 11 : i64} {
  func.func @_cam_kernel(%arg0: i32, %arg1: memref<1x16x256xf32, #tpu.memory_space<vmem>>, %arg2: memref<1xf32, #tpu.memory_space<smem>>, %arg3: memref<1x16x256xf32, #tpu.memory_space<vmem>>) attributes {dimension_semantics = [#tpu.dimension_semantics<parallel>], iteration_bounds = array<i64: 2>, scalar_prefetch = 0 : i64, scratch_operands = 0 : i64, tpu.core_type = #tpu.core_type<tc>, window_params = [{transform_indices = @transform_0, window_bounds = array<i64: 1, 16, 256>}, {transform_indices = @transform_1, window_bounds = array<i64: 1>}, {transform_indices = @transform_2, window_bounds = array<i64: 1, 16, 256>}]} {
    %c0 = arith.constant 0 : index
    %c0_0 = arith.constant 0 : index
    %c0_1 = arith.constant 0 : index
    %0 = vector.load %arg1[%c0, %c0_0, %c0_1] : memref<1x16x256xf32, #tpu.memory_space<vmem>>, vector<1x16x256xf32>
    %1 = vector.shape_cast %0 : vector<1x16x256xf32> to vector<16x256xf32>
    %cst = arith.constant dense<0.000000e+00> : vector<16x16xf32>
    %2 = tpu.matmul %1, %1, %cst {dimension_numbers = #tpu.dot_dimension_numbers<[1], [1], [0], [0], [0, 0, 1, 0], [], []>} : vector<16x256xf32>, vector<16x256xf32>, vector<16x16xf32> -> vector<16x16xf32>
    %cst_2 = arith.constant dense<0x7F800000> : vector<16xf32>
    %3 = vector.multi_reduction <minimumf>, %2, %cst_2 [1] : vector<16x16xf32> to vector<16xf32>
    %4 = vector.shape_cast %3 : vector<16xf32> to vector<16x1xf32>
    %5 = vector.broadcast %4 : vector<16x1xf32> to vector<16x16xf32>
    %6 = arith.subf %5, %2 : vector<16x16xf32>
    %7 = math.exp %6 : vector<16x16xf32>
    %cst_3 = arith.constant dense<0.000000e+00> : vector<16xf32>
    %8 = vector.multi_reduction <add>, %7, %cst_3 [1] : vector<16x16xf32> to vector<16xf32>
    %9 = vector.shape_cast %8 : vector<16xf32> to vector<16x1xf32>
    %10 = tpu.reciprocal %9 : vector<16x1xf32> -> vector<16x1xf32>
    %11 = vector.broadcast %10 : vector<16x1xf32> to vector<16x16xf32>
    %12 = arith.mulf %7, %11 : vector<16x16xf32>
    %cst_4 = arith.constant dense<0.000000e+00> : vector<16x256xf32>
    %13 = tpu.matmul %12, %1, %cst_4 {dimension_numbers = #tpu.dot_dimension_numbers<[1], [0], [0], [1], [0, 0, 1, 1], [], []>} : vector<16x16xf32>, vector<16x256xf32>, vector<16x256xf32> -> vector<16x256xf32>
    %c0_5 = arith.constant 0 : index
    %14 = memref.load %arg2[%c0_5] : memref<1xf32, #tpu.memory_space<smem>>
    %15 = vector.broadcast %14 : f32 to vector<16x256xf32>
    %16 = arith.mulf %15, %13 : vector<16x256xf32>
    %17 = arith.addf %16, %1 : vector<16x256xf32>
    %c0_6 = arith.constant 0 : index
    %c0_7 = arith.constant 0 : index
    %c0_8 = arith.constant 0 : index
    %18 = vector.load %arg3[%c0_6, %c0_7, %c0_8] : memref<1x16x256xf32, #tpu.memory_space<vmem>>, vector<1x16x256xf32>
    %19 = vector.shape_cast %18 : vector<1x16x256xf32> to vector<16x256xf32>
    %20 = vector.shape_cast %17 : vector<16x256xf32> to vector<1x16x256xf32>
    tpu.vector_store %arg3[%c0_6, %c0_7, %c0_8], %20 {strides = array<i32>} : memref<1x16x256xf32, #tpu.memory_space<vmem>>, vector<1x16x256xf32>,
    return
  }
  func.func @transform_0(%arg0: i32) -> (i32, i32, i32) {
    %c0_i32 = arith.constant 0 : i32
    %c0_i32_0 = arith.constant 0 : i32
    %c0_i32_1 = arith.constant 0 : i32
    return %arg0, %c0_i32, %c0_i32_0 : i32, i32, i32
  }
  func.func @transform_1(%arg0: i32) -> i32 {
    %c0_i32 = arith.constant 0 : i32
    %c0_i32_0 = arith.constant 0 : i32
    return %c0_i32 : i32
  }
  func.func @transform_2(%arg0: i32) -> (i32, i32, i32) {
    %c0_i32 = arith.constant 0 : i32
    %c0_i32_0 = arith.constant 0 : i32
    %c0_i32_1 = arith.constant 0 : i32
    return %arg0, %c0_i32, %c0_i32_0 : i32, i32, i32
  }
}

</mosaic_0001>

<bundles_post_ra>
// kernel: pcam_forward.2
= control target key start
LH: loop header
LB: loop body
LE: loop exit
PB: predicated region body
PF: predicated region fallthrough
CT: control target
= control target key end

     0   :  { %s393_s12 = smov 0   ;;  %s426_s0 = inlined_call_operand.vmem [shape: f32[2,4,16], index: 0, kind: input, shape index: {}]   ;;  %s427_s1 = inlined_call_operand.vmem [shape: f32[16,20], index: 1, kind: input, shape index: {}]   ;;  %s428_s2 = inlined_call_operand.vmem [shape: f32[1,20], index: 2, kind: input, shape index: {}]   ;;  %s429_s3 = inlined_call_operand.vmem [shape: f32[2,4,16], index: 3, kind: output, shape index: {}]  }
   0x1 LB: > { %s334_s13 = sadd.s32 4294967295, %s369_s12   ;;  %p338_p0 = scmp.ge.s32.totalorder %s369_s12, 1  ;;  %s369_s12 = sphi %s393_s12, %s13_s12  }
   0x2   : > { %p136_p1 = scmp.lt.s32.totalorder %s369_s12, 3 }
   0x4   : > { %p137_p2 = pnand %p338_p0, %p136_p1 }
   0x5   : > { %p158_p3 = scmp.lt.s32.totalorder (!%p137_p2), %s334_s13, 1  ;;  %s371_s24 = smov (!%p137_p2), 126  }
   0x6   : > { %140 = sbr.rel (%p137_p2) target bundleno = 790 (0x316), region = 32  ;;  %s372_s25 = smov (!%p137_p2), 124  }
   0xb   : > { %v168_v0 = vld [vmem:[%s427_s1 + $0x8] sm:$0xff]  ;;  %v167_v1 = vld [vmem:[%s427_s1] sm:$0xff]  ;;  %s431_s13 = smov (!%p158_p3, %s334_s13), 1  ;;  %vm173_vm0 = vcmask 130048   ;;  %vm200_vm1 = vcmask 15360   ;;  %vm225_vm2 = vcmask 27648  }
   0xc   : > { %191 = vmatpush.msra.mxu0 %v168_v0  ;;  %s339_s18 = sshll.u32 %s431_s13, 2  ;;  %v358_v3 = vld [vmem:[%s428_s2] ss:$0 sm:$0xff]  ;;  %vm256_vm7 = vcmask 1043456   ;;  %vm252_vm8 = vcmask 31744   ;;  %vm279_vm9 = vcmask 125952  }
   0xd   : > { %s161_s21 = scalar_lea.vmem %s426_s0, %s339_s18  ;;  %s165_s28 = scalar_lea.vmem %s429_s3, %s339_s18 }
   0xe   : > { %192 = vmatpush.msra.mxu0 %v167_v1  ;;  %v166_v2 = vld [vmem:[%s161_s21] sm:$0xf] }
   0xf   : > { %341 = vmatmul.msk.f32.vlgmr.msra.gmra.mxu0 %vm173_vm0, %v166_v2 }
  0x8c   : > { %v194_v4 = vpop.f32.mrf.mxu0 }
  0x8d   : > { %v195_v5 = vadd.f32 %v358_v3, %v194_v4 }
  0x8f   : > { %198 = vrot.lane.b32.xlu0 %v195_v5, %s371_s24 }
 0x101   : > { %v199_v6 = vpop.permute.xlu0 %198 }
 0x102   : > { %342 = vmatpush.xpose.msk.msra.mxu1 %vm200_vm1, %v199_v6 }
 0x105   : > { %343 = vmatmul.msk.f32.vlgmr.msra.gmra.mxu1 %vm200_vm1, %v195_v5 }
 0x182   : > { %v222_v7 = vpop.f32.mrf.mxu1 }
 0x183   : > { %v226_v8 = vsel %vm225_vm2, %v222_v7, -inf }
 0x184   : > { %227 = vmax.xlane.f32.xlu0 %v226_v8 }
 0x1f7   : > { %v228_v9 = vpop.xlane.xlu0 %227 }
 0x1f8   : > { %v229_v10 = vsub.f32 %v222_v7, %v228_v9 }
 0x1fa   : > { %v230_v11 = vmul.f32 1.442695, %v229_v10 }
 0x1fc   : > { %359 = vpow2.f32 %v230_v11 }
 0x202   : > { %v360_v12 = vpop.eup %359 }
 0x203   : > { %v232_v13 = vsel %vm225_vm2, %v360_v12, 0.0 }
 0x204   : > { %233 = vadd.xlane.f32.xlu1 %v232_v13 }
 0x21d   : > { %250 = vrot.lane.b32.xlu1 %v195_v5, %s372_s25 }
 0x277   : > { %v234_v14 = vpop.xlane.xlu1 %233 }
 0x278   : > { %361 = vrcp.f32 %v234_v14  ;;  %v246_v20 = vand.u32 2147483648, %v234_v14  ;;  %vm240_vm4 = vweird.f32 %v234_v14  ;;  %v244_v21 = vand.u32 2147483647, %v234_v14 }
 0x27a   : > { %v247_v23 = vor.u32 1.1754944e-38, %v246_v20  ;;  %vm245_vm6 = vcmp.eq.f32.partialorder %v244_v21, 8.507059e+37 }
 0x27e   : > { %v362_v15 = vpop.eup %361 }
 0x27f   : > { %v236_v16 = vmul.f32 %v362_v15, %v234_v14  ;;  %vm241_vm3 = vweird.f32 %v362_v15 }
 0x280   : > { %vm242_vm5 = vmor %vm240_vm4, %vm241_vm3 }
 0x281   : > { %v237_v17 = vsub.f32 1.0, %v236_v16 }
 0x283   : > { %v238_v18 = vmul.f32 %v362_v15, %v237_v17 }
 0x285   : > { %v239_v19 = vadd.f32 %v362_v15, %v238_v18 }
 0x287   : > { %v243_v22 = vsel %vm242_vm5, %v362_v15, %v239_v19 }
 0x288   : > { %v248_v24 = vsel %vm245_vm6, %v247_v23, %v243_v22 }
 0x289   : > { %v249_v26 = vmul.f32 %v360_v12, %v248_v24 }
 0x28f   : > { %v251_v25 = vpop.permute.xlu1 %250 }
 0x290   : > { %344 = vmatpush.msk.msra.mxu2 %vm256_vm7, %v251_v25 }
 0x291   : > { %345 = vmatmul.msk.f32.vlgmr.msra.gmra.mxu2 %vm252_vm8, %v249_v26 }
 0x314   : > { %v276_v27 = vpop.f32.mrf.mxu2 }
 0x315   : > { %280 = vst.msk [vmem:[%s165_s28] sm:$0xf] %vm279_vm9, %v276_v27 }
 0x316 PF: > { %s13_s12 = sadd.s32 1, %s369_s12  }
 0x317   : > { %p10_p4 = scmp.ge.s32.totalorder %s13_s12, 4  }
 0x319   :  { %12 = sbr.rel (!%p10_p4) target bundleno = 1 (0x1), region = 62 }

// kernel: pcam_forward.3
= control target key start
LH: loop header
LB: loop body
LE: loop exit
PB: predicated region body
PF: predicated region fallthrough
CT: control target
= control target key end

     0   :  { %s424_s11 = smov 0   ;;  %s480_s0 = inlined_call_operand.vmem [shape: f32[2,16,256], index: 0, kind: input, shape index: {}]   ;;  %s481_s1 = inlined_call_operand.<no memory space> [shape: f32[1], index: 1, kind: input, shape index: {}]   ;;  %s482_s2 = inlined_call_operand.vmem [shape: f32[2,16,256], index: 2, kind: output, shape index: {}]  }
   0x1   :  { %7 = sst [smem:[#allocation2]] %s481_s1 }
   0x2 LB: > { %s365_s12 = sadd.s32 4294967295, %s404_s11   ;;  %p369_p0 = scmp.ge.s32.totalorder %s404_s11, 1  ;;  %s404_s11 = sphi %s424_s11, %s13_s11  }
   0x3   : > { %p113_p1 = scmp.lt.s32.totalorder %s404_s11, 3 }
   0x5   : > { %p114_p2 = pnand %p369_p0, %p113_p1 }
   0x6   : > { %p135_p3 = scmp.lt.s32.totalorder (!%p114_p2), %s365_s12, 1  ;;  %s296_s16 = sld [smem:[#allocation2]] (!%p114_p2) }
   0x7   : > { %117 = sbr.rel (%p114_p2) target bundleno = 561 (0x231), region = 28 }
   0xc   : > { %s484_s12 = smov (!%p135_p3, %s365_s12), 1  ;;  %vm195_vm0 = vcmask 130048   ;;  %v297_v46 = vstv %s296_s16 }
   0xd   : > { %s380_s1 = sshll.u32 %s484_s12, 5 }
   0xe   : > { %s139_s15 = scalar_lea.vmem %s480_s0, %s380_s1  ;;  %s144_s19 = scalar_lea.vmem %s482_s2, %s380_s1 }
   0xf   : > { %v440_v0 = vld [vmem:[%s139_s15 + $0x10] sm:$0xff]  ;;  %v442_v1 = vld [vmem:[%s139_s15 + $0x18] sm:$0xff]  ;;  %v446_v2 = vld [vmem:[%s139_s15] sm:$0xff] }
  0x10   : > { %163 = vmatpush.xpose.msra.mxu0 %v440_v0  ;;  %186 = vmatpush.xpose.msra.mxu1 %v442_v1  ;;  %v448_v3 = vld [vmem:[%s139_s15 + $0x8] sm:$0xff] }
  0x11   : > { %264 = vmatpush.msra.mxu2 %v440_v0  ;;  %287 = vmatpush.msra.mxu3 %v442_v1 }
  0x13   : > { %265 = vmatpush.msra.mxu2 %v446_v2  ;;  %288 = vmatpush.msra.mxu3 %v448_v3 }
  0x14   : > { %164 = vmatpush.xpose.msra.mxu0 %v446_v2  ;;  %187 = vmatpush.xpose.msra.mxu1 %v448_v3 }
  0x17   : > { %165 = vmatmul.f32.vlgmr.msra.gmra.mxu0 %v446_v2  ;;  %188 = vmatmul.f32.vlgmr.msra.gmra.mxu1 %v448_v3 }
  0x1f   : > { %168 = vmatmul.f32.gmra.mxu0 %v440_v0  ;;  %191 = vmatmul.f32.gmra.mxu1 %v442_v1 }
  0x94   : > { %v166_v4 = vpop.f32.mrf.mxu0  ;;  %v189_v5 = vpop.f32.mrf.mxu1 }
  0x95   : > { %v190_v6 = vadd.f32 %v189_v5, %v166_v4 }
  0x97   : > { %v196_v7 = vsel %vm195_vm0, %v190_v6, inf }
  0x98   : > { %197 = vmin.xlane.f32.xlu0 %v196_v7 }
  0x9c   : > { %v169_v8 = vpop.f32.mrf.mxu0  ;;  %v192_v9 = vpop.f32.mrf.mxu1 }
  0x9d   : > { %v193_v10 = vadd.f32 %v192_v9, %v169_v8 }
  0x9f   : > { %v199_v11 = vsel %vm195_vm0, %v193_v10, inf }
  0xa0   : > { %200 = vmin.xlane.f32.xlu0 %v199_v11 }
 0x10b   : > { %v198_v12 = vpop.xlane.xlu0 %197 }
 0x10c   : > { %v202_v13 = vsub.f32 %v198_v12, %v190_v6 }
 0x10e   : > { %v204_v14 = vmul.f32 1.442695, %v202_v13 }
 0x110   : > { %390 = vpow2.f32 %v204_v14 }
 0x113   : > { %v201_v15 = vpop.xlane.xlu0 %200 }
 0x114   : > { %v203_v16 = vsub.f32 %v201_v15, %v193_v10 }
 0x116   : > { %v391_v17 = vpop.eup %390  ;;  %v206_v18 = vmul.f32 1.442695, %v203_v16 }
 0x117   : > { %v208_v19 = vsel %vm195_vm0, %v391_v17, 0.0 }
 0x118   : > { %392 = vpow2.f32 %v206_v18  ;;  %209 = vadd.xlane.f32.xlu1 %v208_v19 }
 0x11e   : > { %v393_v20 = vpop.eup %392 }
 0x11f   : > { %v211_v21 = vsel %vm195_vm0, %v393_v20, 0.0 }
 0x120   : > { %212 = vadd.xlane.f32.xlu1 %v211_v21 }
 0x18b   : > { %v210_v22 = vpop.xlane.xlu1 %209 }
 0x18c   : > { %394 = vrcp.f32 %v210_v22  ;;  %v225_v27 = vand.u32 2147483648, %v210_v22  ;;  %v223_v29 = vand.u32 2147483647, %v210_v22  ;;  %vm219_vm2 = vweird.f32 %v210_v22 }
 0x18e   : > { %v226_v32 = vor.u32 1.1754944e-38, %v225_v27  ;;  %vm224_vm4 = vcmp.eq.f32.partialorder %v223_v29, 8.507059e+37 }
 0x192   : > { %v395_v23 = vpop.eup %394 }
 0x193   : > { %v215_v24 = vmul.f32 %v395_v23, %v210_v22  ;;  %v213_v25 = vpop.xlane.xlu1 %212  ;;  %vm220_vm1 = vweird.f32 %v395_v23 }
 0x194   : > { %396 = vrcp.f32 %v213_v25  ;;  %vm221_vm3 = vmor %vm219_vm2, %vm220_vm1  ;;  %v239_v38 = vand.u32 2147483648, %v213_v25  ;;  %v237_v40 = vand.u32 2147483647, %v213_v25  ;;  %vm233_vm6 = vweird.f32 %v213_v25 }
 0x195   : > { %v216_v26 = vsub.f32 1.0, %v215_v24 }
 0x196   : > { %v240_v42 = vor.u32 1.1754944e-38, %v239_v38  ;;  %vm238_vm8 = vcmp.eq.f32.partialorder %v237_v40, 8.507059e+37 }
 0x197   : > { %v217_v28 = vmul.f32 %v395_v23, %v216_v26 }
 0x199   : > { %v218_v30 = vadd.f32 %v395_v23, %v217_v28 }
 0x19a   : > { %v397_v31 = vpop.eup %396 }
 0x19b   : > { %v229_v33 = vmul.f32 %v397_v31, %v213_v25  ;;  %v222_v34 = vsel %vm221_vm3, %v395_v23, %v218_v30  ;;  %vm234_vm5 = vweird.f32 %v397_v31 }
 0x19c   : > { %v227_v35 = vsel %vm224_vm4, %v226_v32, %v222_v34  ;;  %vm235_vm7 = vmor %vm233_vm6, %vm234_vm5 }
 0x19d   : > { %v230_v36 = vsub.f32 1.0, %v229_v33  ;;  %v242_v37 = vmul.f32 %v391_v17, %v227_v35 }
 0x19f   : > { %v231_v39 = vmul.f32 %v397_v31, %v230_v36  ;;  %374 = vmatmul.msk.f32.vlgmr.msra.gmra.mxu2 %vm195_vm0, %v242_v37  ;;  %376 = vmatmul.msk.f32.vlgmr.msra.gmra.mxu3 %vm195_vm0, %v242_v37 }
 0x1a1   : > { %v232_v41 = vadd.f32 %v397_v31, %v231_v39 }
 0x1a3   : > { %v236_v43 = vsel %vm235_vm7, %v397_v31, %v232_v41 }
 0x1a4   : > { %v241_v44 = vsel %vm238_vm8, %v240_v42, %v236_v43 }
 0x1a5   : > { %v243_v45 = vmul.f32 %v393_v20, %v241_v44 }
 0x1a7   : > { %375 = vmatmul.msk.f32.gmra.mxu2 %vm195_vm0, %v243_v45  ;;  %377 = vmatmul.msk.f32.gmra.mxu3 %vm195_vm0, %v243_v45 }
 0x222   : > { %v267_v47 = vpop.f32.mrf.mxu2  ;;  %v290_v48 = vpop.f32.mrf.mxu3 }
 0x223   : > { %v298_v49 = vmul.f32 %v297_v46, %v267_v47  ;;  %v299_v50 = vmul.f32 %v297_v46, %v290_v48 }
 0x225   : > { %v302_v51 = vadd.f32 %v298_v49, %v446_v2  ;;  %v303_v52 = vadd.f32 %v299_v50, %v448_v3 }
 0x227   : > { %306 = vst [vmem:[%s144_s19] sm:$0xff] %v302_v51 }
 0x228   : > { %307 = vst [vmem:[%s144_s19 + $0x8] sm:$0xff] %v303_v52 }
 0x22a   : > { %v270_v53 = vpop.f32.mrf.mxu2  ;;  %v293_v54 = vpop.f32.mrf.mxu3 }
 0x22b   : > { %v300_v55 = vmul.f32 %v297_v46, %v270_v53  ;;  %v301_v56 = vmul.f32 %v297_v46, %v293_v54 }
 0x22d   : > { %v304_v57 = vadd.f32 %v300_v55, %v440_v0  ;;  %v305_v58 = vadd.f32 %v301_v56, %v442_v1 }
 0x22f   : > { %308 = vst [vmem:[%s144_s19 + $0x10] sm:$0xff] %v304_v57 }
 0x230   : > { %309 = vst [vmem:[%s144_s19 + $0x18] sm:$0xff] %v305_v58 }
 0x231 PF: > { %s13_s11 = sadd.s32 1, %s404_s11  }
 0x232   : > { %p10_p4 = scmp.ge.s32.totalorder %s13_s11, 4  }
 0x234   :  { %12 = sbr.rel (!%p10_p4) target bundleno = 2 (0x2), region = 58 }

</bundles_post_ra>
